<compile_context>
chip_gen: v7x
topology: tpu7x:2x2x1
jax: 0.10.0
libtpu: 0.0.40
codegen_flags: <defaults>
</compile_context>

<pallas_src>
import math

import jax
import jax.numpy as jnp
from jax.experimental import pallas as pl
from jax.experimental.pallas import tpu as pltpu

# ---- module hyper-parameters (from the PyTorch source) ----------------------
NUM_LAYER = 2
NUM_QUBITS = 4
NUM_ANGLES = NUM_LAYER * (2 * NUM_QUBITS - 1)   # = 14
INPUT_SIZE = 16                                  # vocab size for one_hot

LANE = 128          # lane-dense padding of the angle dimension
ROW_BLOCK = 256     # rows per grid step (MXU-friendly, shards across 2 TCs on v7x)

# demo sizes (batch of sequences; all timesteps fused into one kernel call)
BATCH = 8
SEQ_LEN = 64


def _round_up(x, m):
    return ((x + m - 1) // m) * m


# -----------------------------------------------------------------------------
# kernel: one_hot(idx, V) @ W^T + b for one row-block, fully fused on the MXU
# -----------------------------------------------------------------------------
def _qrnn_angles_kernel(idx_ref, w_ref, b_ref, ang_ref):
    """idx_ref : (TM, 1)      int32   token indices (row block)
       w_ref   : (V, A_pad)   float32 Linear weight, pre-transposed + padded
       b_ref   : (1, A_pad)   float32 Linear bias, padded
       ang_ref : (TM, A_pad)  float32 output angles (lane-dense block)
    """
    tm = idx_ref.shape[0]
    v = w_ref.shape[0]
    idx = idx_ref[...]                                         # (TM, 1) int32
    vocab_ids = jax.lax.broadcasted_iota(jnp.int32, (tm, v), 1)
    one_hot = (idx == vocab_ids).astype(jnp.float32)           # (TM, V)
    ang_ref[...] = jnp.dot(one_hot, w_ref[...],
                           preferred_element_type=jnp.float32) + b_ref[...]


# -----------------------------------------------------------------------------
# parameter prep: done once, outside the recurrent path
# -----------------------------------------------------------------------------
def prepare_params(weight, bias, lane=LANE):
    """weight: (num_angles, input_size) f32 (PyTorch Linear layout)
       bias  : (num_angles,)            f32
       returns (W^T padded to (V, A_pad), bias padded to (1, A_pad))."""
    a, v = weight.shape
    a_pad = _round_up(max(a, lane), lane)
    w_t = jnp.zeros((v, a_pad), jnp.float32).at[:, :a].set(weight.T)
    b2d = jnp.zeros((1, a_pad), jnp.float32).at[:, :a].set(bias)
    return w_t, b2d


# -----------------------------------------------------------------------------
# wrapper: one pallas_call over ALL fused tokens
# -----------------------------------------------------------------------------
def qrnn_angles(indices, w_t, b2d, num_angles, *, row_block=ROW_BLOCK):
    """indices : (N,) int token indices (N = batch * seq, already flattened)
       w_t     : (V, A_pad)  pre-padded transposed weight (prepare_params)
       b2d     : (1, A_pad)  pre-padded bias
       returns : (N, num_angles) float32 angles."""
    n = indices.shape[0]
    v, a_pad = w_t.shape

    tm = min(row_block, _round_up(n, 8))          # sublane-aligned row block
    n_pad = _round_up(n, tm)
    idx2d = jnp.zeros((n_pad, 1), jnp.int32).at[:n, 0].set(
        indices.astype(jnp.int32))

    grid = (n_pad // tm,)
    cost = pl.CostEstimate(
        flops=2 * n_pad * v * a_pad,
        transcendentals=0,
        bytes_accessed=(n_pad * 4) + (v * a_pad * 4) + (a_pad * 4)
        + (n_pad * a_pad * 4),
    )

    out = pl.pallas_call(
        _qrnn_angles_kernel,
        out_shape=jax.ShapeDtypeStruct((n_pad, a_pad), jnp.float32),
        grid=grid,
        in_specs=[
            pl.BlockSpec((tm, 1), lambda i: (i, 0)),       # token ids, row block
            pl.BlockSpec((v, a_pad), lambda i: (0, 0)),    # whole weight, resident
            pl.BlockSpec((1, a_pad), lambda i: (0, 0)),    # bias
        ],
        out_specs=pl.BlockSpec((tm, a_pad), lambda i: (i, 0)),  # lane-dense block
        compiler_params=pltpu.CompilerParams(
            dimension_semantics=("parallel",)),            # v7x: both TCs get rows
        cost_estimate=cost,
    )(idx2d, w_t, b2d)

    return out[:n, :num_angles]


# -----------------------------------------------------------------------------
# forward-pass semantics of the PyTorch module
# -----------------------------------------------------------------------------
def _slice_layers(angles):
    """Per-layer rxx / rz angle slices exactly as QRNN.forward hands them to
    circuit.rxx_layer / circuit.rz_layer."""
    rxx_angles, rz_angles = [], []
    ang = 0
    for _ in range(NUM_LAYER):
        rxx_angles.append(angles[..., ang:ang + NUM_QUBITS - 1])
        ang += NUM_QUBITS - 1
        rz_angles.append(angles[..., ang:ang + NUM_QUBITS])
        ang += NUM_QUBITS
    return rxx_angles, rz_angles


def qrnn_forward(indices, w_t, b2d):
    """Single-step QRNN.forward (minus the undefined FFQuantumDevice)."""
    angles = qrnn_angles(indices, w_t, b2d, NUM_ANGLES)
    rxx_angles, rz_angles = _slice_layers(angles)
    # TODO(synk): FFQuantumDevice (circuit.rxx_layer / circuit.rz_layer) is not
    # defined in the provided source; the angle slices above are what the
    # forward feeds into it.
    return angles, rxx_angles, rz_angles


def qrnn_forward_sequence(indices_bt, w_t, b2d):
    """Fused path: compute the angles for ALL (batch, time) tokens in one
    kernel launch, then expose per-timestep rxx/rz slices for the circuit."""
    b, t = indices_bt.shape
    flat = indices_bt.reshape(b * t)
    angles = qrnn_angles(flat, w_t, b2d, NUM_ANGLES).reshape(b, t, NUM_ANGLES)
    rxx_angles, rz_angles = _slice_layers(angles)   # each: (B, T, nq-1)/(B, T, nq)
    return angles, rxx_angles, rz_angles


if __name__ == "__main__":
    key = jax.random.PRNGKey(0)
    k_idx, k_w, k_b = jax.random.split(key, 3)

    # deterministic parameters (PyTorch Linear init: U(-1/sqrt(fan_in), +))
    bound = 1.0 / math.sqrt(INPUT_SIZE)
    weight = jax.random.uniform(k_w, (NUM_ANGLES, INPUT_SIZE),
                                minval=-bound, maxval=bound, dtype=jnp.float32)
    bias = jax.random.uniform(k_b, (NUM_ANGLES,),
                              minval=-bound, maxval=bound, dtype=jnp.float32)

    # params pre-transposed / pre-padded once (not on the recurrent path)
    w_t, b2d = prepare_params(weight, bias)

    # deterministic example input: (BATCH, SEQ_LEN) token indices in [0, V)
    indices_bt = jax.random.randint(k_idx, (BATCH, SEQ_LEN), 0, INPUT_SIZE,
                                    dtype=jnp.int32)

    # fused forward: one pallas_call for all BATCH*SEQ_LEN tokens
    angles, rxx_angles, rz_angles = qrnn_forward_sequence(indices_bt, w_t, b2d)
    jax.block_until_ready(angles)

    # reference: plain-JAX one_hot + Linear
    one_hot_ref = jax.nn.one_hot(indices_bt.reshape(-1), INPUT_SIZE,
                                 dtype=jnp.float32)
    angles_ref = (one_hot_ref @ weight.T + bias).reshape(BATCH, SEQ_LEN,
                                                         NUM_ANGLES)
    assert jnp.allclose(angles, angles_ref, atol=1e-5, rtol=1e-5)
    assert angles.shape == (BATCH, SEQ_LEN, NUM_ANGLES)
    assert rxx_angles[0].shape == (BATCH, SEQ_LEN, NUM_QUBITS - 1)
    assert rz_angles[0].shape == (BATCH, SEQ_LEN, NUM_QUBITS)

    # single-step path (matches the original module's per-call signature)
    step_angles, step_rxx, step_rz = qrnn_forward(indices_bt[:, 0], w_t, b2d)
    jax.block_until_ready(step_angles)
    assert jnp.allclose(step_angles, angles_ref[:, 0], atol=1e-5, rtol=1e-5)
    assert step_rxx[0].shape == (BATCH, NUM_QUBITS - 1)
    assert step_rz[0].shape == (BATCH, NUM_QUBITS)

    print("KERNEL_OK")
</pallas_src>

<mosaic_0001>
module attributes {stable_mosaic.version = 11 : i64} {
  func.func @_qrnn_angles_kernel(%arg0: i32, %arg1: memref<256x1xi32, #tpu.memory_space<vmem>>, %arg2: memref<16x128xf32, #tpu.memory_space<vmem>>, %arg3: memref<1x128xf32, #tpu.memory_space<vmem>>, %arg4: memref<256x128xf32, #tpu.memory_space<vmem>>) attributes {dimension_semantics = [#tpu.dimension_semantics<parallel>], iteration_bounds = array<i64: 2>, scalar_prefetch = 0 : i64, scratch_operands = 0 : i64, tpu.core_type = #tpu.core_type<tc>, window_params = [{transform_indices = @transform_0, window_bounds = array<i64: 256, 1>}, {pipeline_mode = #tpu.pipeline_mode<synchronous>, transform_indices = @transform_1, window_bounds = array<i64: 16, 128>}, {pipeline_mode = #tpu.pipeline_mode<synchronous>, transform_indices = @transform_2, window_bounds = array<i64: 1, 128>}, {transform_indices = @transform_3, window_bounds = array<i64: 256, 128>}]} {
    %c0 = arith.constant 0 : index
    %c0_0 = arith.constant 0 : index
    %0 = vector.load %arg1[%c0, %c0_0] : memref<256x1xi32, #tpu.memory_space<vmem>>, vector<256x1xi32>
    %1 = tpu.iota {dimensions = array<i32: 1>} : vector<256x16xi32>
    %2 = vector.broadcast %0 : vector<256x1xi32> to vector<256x16xi32>
    %3 = arith.cmpi eq, %2, %1 : vector<256x16xi32>
    %4 = arith.extui %3 : vector<256x16xi1> to vector<256x16xi32>
    %5 = arith.sitofp %4 : vector<256x16xi32> to vector<256x16xf32>
    %c0_1 = arith.constant 0 : index
    %c0_2 = arith.constant 0 : index
    %6 = vector.load %arg2[%c0_1, %c0_2] : memref<16x128xf32, #tpu.memory_space<vmem>>, vector<16x128xf32>
    %cst = arith.constant dense<0.000000e+00> : vector<256x128xf32>
    %7 = tpu.matmul %5, %6, %cst {dimension_numbers = #tpu.dot_dimension_numbers<[1], [0], [0], [1], [0, 0, 1, 1], [], []>} : vector<256x16xf32>, vector<16x128xf32>, vector<256x128xf32> -> vector<256x128xf32>
    %c0_3 = arith.constant 0 : index
    %c0_4 = arith.constant 0 : index
    %8 = vector.load %arg3[%c0_3, %c0_4] : memref<1x128xf32, #tpu.memory_space<vmem>>, vector<1x128xf32>
    %9 = vector.broadcast %8 : vector<1x128xf32> to vector<256x128xf32>
    %10 = arith.addf %7, %9 : vector<256x128xf32>
    %c0_5 = arith.constant 0 : index
    %c0_6 = arith.constant 0 : index
    %11 = vector.load %arg4[%c0_5, %c0_6] : memref<256x128xf32, #tpu.memory_space<vmem>>, vector<256x128xf32>
    tpu.vector_store %arg4[%c0_5, %c0_6], %10 {strides = array<i32>} : memref<256x128xf32, #tpu.memory_space<vmem>>, vector<256x128xf32>,
    return
  }
  func.func @transform_0(%arg0: i32) -> (i32, i32) {
    %c0_i32 = arith.constant 0 : i32
    %c0_i32_0 = arith.constant 0 : i32
    return %arg0, %c0_i32 : i32, i32
  }
  func.func @transform_1(%arg0: i32) -> (i32, i32) {
    %c0_i32 = arith.constant 0 : i32
    %c0_i32_0 = arith.constant 0 : i32
    %c0_i32_1 = arith.constant 0 : i32
    return %c0_i32, %c0_i32_0 : i32, i32
  }
  func.func @transform_2(%arg0: i32) -> (i32, i32) {
    %c0_i32 = arith.constant 0 : i32
    %c0_i32_0 = arith.constant 0 : i32
    %c0_i32_1 = arith.constant 0 : i32
    return %c0_i32, %c0_i32_0 : i32, i32
  }
  func.func @transform_3(%arg0: i32) -> (i32, i32) {
    %c0_i32 = arith.constant 0 : i32
    %c0_i32_0 = arith.constant 0 : i32
    return %arg0, %c0_i32 : i32, i32
  }
}

</mosaic_0001>

<bundles_post_ra>
// kernel: tpu_custom_call.1
= control target key start
LH: loop header
LB: loop body
LE: loop exit
PB: predicated region body
PF: predicated region fallthrough
CT: control target
= control target key end

     0   :  { %8 = vsyncpa [#allocation3], 0  ;;  %s1457_s0 = inlined_call_operand.vmem [shape: s32[512,1], index: 0, kind: input, shape index: {}]   ;;  %s1458_s1 = inlined_call_operand.vmem [shape: f32[16,128], index: 1, kind: input, shape index: {}]   ;;  %s1459_s2 = inlined_call_operand.vmem [shape: f32[1,128], index: 2, kind: input, shape index: {}]   ;;  %s1460_s3 = inlined_call_operand.hbm [shape: f32[512,128], index: 3, kind: output, shape index: {}]  }
   0x1   :  { %10 = vsyncpa [#allocation3 + $0x1], 0  ;;  %s1141_s12 = smov 0   ;;  %s1143_s13 = smov 0  }
   0x2   :  { %s1145_s14 = smov 0   ;;  %s1147_s15 = smov 0  }
   0x3 LB: > { %s1162_s16 = sadd.s32 4294967295, %s1114_s15   ;;  %s837_s17 = sadd.s32 4294967294, %s1114_s15   ;;  %s1114_s15 = sphi %s1147_s15, %s1466_s15   ;;  %s1110_s14 = sphi %s1145_s14, %s1465_s14   ;;  %s1106_s13 = sphi %s1143_s13, %s1464_s13   ;;  %s1102_s12 = sphi %s1141_s12, %s1463_s12  }
   0x4   : > { %s1166_s18 = sadd.s32 1, %s1114_s15   ;;  %s91_s19 = sadd.s32 1, %s1110_s14 }
   0x5   : > { %s88_s20 = ssub.s32 %s1114_s15, %s1166_s18  ;;  %p101_p0 = scmp.ne.s32.totalorder %s1110_s14, %s1106_s13 }
   0x6   : > { %p89_p1 = scmp.eq.s32.totalorder %s88_s20, 0  ;;  %p102_p2 = scmp.eq.s32.totalorder %s1162_s16, 1 }
   0x7   : > { %p107_p3 = scmp.ne.s32.totalorder %s1106_s13, %s1102_s12  ;;  %p108_p4 = scmp.eq.s32.totalorder %s837_s17, 1 }
   0x8   : > { %s1177_s21 = scalar_select %p89_p1, %s1110_s14, %s91_s19  }
   0x9   : > { %p1179_p5 = por %p102_p2, %p101_p0  ;;  %p1183_p6 = por %p108_p4, %p107_p3 }
   0xa   : > { %p840_p7 = scmp.ge.s32.totalorder %s1114_s15, 1  ;;  %p141_p8 = scmp.lt.s32.totalorder %s1114_s15, 3 }
   0xc   : > { %p142_p9 = pnand %p840_p7, %p141_p8 }
   0xd   : > { %s842_s24 = sshll.u32 (!%p142_p9), %s1162_s16, 5  ;;  %v398_v0 = vld [vmem:[%s1458_s1] sm:$0xff] (!%p142_p9)  ;;  %v399_v1 = vld [vmem:[%s1458_s1 + $0x8] sm:$0xff] (!%p142_p9)  ;;  %v1116_v2 = vmov (!%p142_p9), 0   ;;  %v204_v36 = vlaneseq (!%p142_p9)  ;;  %vm407_vm0 = vcmask (!%p142_p9), 130048   ;;  %v1117_v40 = vmov (!%p142_p9), 0.0  }
   0xe   : > { %145 = sbr.rel (%p142_p9) target bundleno = 445 (0x1bd), region = 32  ;;  %1051 = vset.pattern.permute.xlu1 (!%p142_p9), %v1116_v2  ;;  %1050 = vset.pattern.permute.xlu0 (!%p142_p9), %v1116_v2  ;;  %p166_p10 = scmp.lt.s32.totalorder (!%p142_p9), %s842_s24, 63  ;;  %v1001_v3 = vpack.c.bf16 (!%p142_p9), %v399_v1, %v398_v0 }
   0xf   : > { %v1233_v37 = vand.u32 (!%p142_p9), 127, %v204_v36  ;;  %s162_s6 = sand.u32 (!%p142_p9), 1, %s1106_s13   ;;  %s914_s11 = sshll.u32 (!%p142_p9), %s1162_s16, 12 }
  0x10   : > { %1002 = vmatprep.subr.bf16.mxu0 (!%p142_p9), %v1001_v3  ;;  %1005 = vmatprep.subr.bf16.mxu1 (!%p142_p9), %v1001_v3  ;;  %s841_s7 = sshll.u32 (!%p142_p9), %s162_s6, 8  ;;  %s1416_s16 = scalar_lea.sflag (!%p142_p9), [#allocation3], %s162_s6 }
  0x11   : > { %1004 = vmatpush3.bf16.msra.mxu0 (!%p142_p9), %v1001_v3  ;;  %1006 = vmatpush3.bf16.msra.mxu1 (!%p142_p9), %v1001_v3  ;;  %s1341_s10 = scalar_lea.vmem (!%p142_p9), [#allocation2], %s841_s7  ;;  %s1118_s26 = smov (!%p142_p9), [#allocation2]  }
  0x12   : > { %s775_s17 = sshll.u32 (!%p142_p9), %s1341_s10, 4  ;;  %s1056_s27 = sshll.u32 (!%p142_p9), %s1118_s26, 4  ;;  %s1406_s17 = int_to_ptr.vmem [resolvable:$true] %s775_s17  ;;  %s1057_s27 = int_to_ptr.vmem [resolvable:$false] %s1056_s27 }
  0x13   : > { %s1052_s25 = scalar_lea.vmem (!%p142_p9), %s1406_s17, 4096  ;;  %s1058_s28 = scalar_lea.vmem (!%p142_p9), %s1057_s27, 8192 }
  0x14   : > { %p1053_p11 = scmp.ne.s32.totalorder (!%p142_p9), %s1406_s17, %s1052_s25  ;;  %p1059_p0 = scmp.lt.s32.totalorder (!%p142_p9), %s1406_s17, %s1057_s27 }
  0x15   : > { %s1468_s24 = smov (!%p166_p10, %s842_s24), 63  ;;  %p1060_p1 = scmp.lt.s32.totalorder %s1058_s28, %s1052_s25 }
  0x16   : > { %s843_s29 = sshll.u32 %s1468_s24, 3  ;;  %s1404_s24 = scalar_lea.hbm %s1460_s3, %s914_s11 }
  0x17   : > { %s1199_s5 = scalar_lea.vmem %s1457_s0, %s843_s29  ;;  %p1054_p12 = pnand %p1053_p11, %p1179_p5 }
  0x18   : > { %v173_v4 = vld [vmem:[%s1199_s5 + $0x8] sm:$0xff]  ;;  %v172_v5 = vld [vmem:[%s1199_s5] sm:$0xff]  ;;  %v190_v8 = vld [vmem:[%s1199_s5 + $0x90] sm:$0xff]  ;;  %p1061_p2 = por %p1060_p1, %p1059_p0 }
  0x19   : > { %210 = vperm.xlu1 %1051, %v173_v4   ;;  %207 = vperm.xlu0 %1050, %v172_v5   ;;  %v189_v6 = vld [vmem:[%s1199_s5 + $0x88] sm:$0xff]  ;;  %v188_v7 = vld [vmem:[%s1199_s5 + $0x80] sm:$0xff]  ;;  %v174_v9 = vld [vmem:[%s1199_s5 + $0x10] sm:$0xff]  ;;  %p1055_p13 = pneg %p1054_p12 }
  0x1a   : > { %v191_v10 = vld [vmem:[%s1199_s5 + $0x98] sm:$0xff]  ;;  %v192_v12 = vld [vmem:[%s1199_s5 + $0xa0] sm:$0xff]  ;;  %v193_v14 = vld [vmem:[%s1199_s5 + $0xa8] sm:$0xff] }
  0x1b   : > { %v175_v11 = vld [vmem:[%s1199_s5 + $0x18] sm:$0xff]  ;;  %v176_v13 = vld [vmem:[%s1199_s5 + $0x20] sm:$0xff]  ;;  %v177_v15 = vld [vmem:[%s1199_s5 + $0x28] sm:$0xff]  ;;  %p1062_p3 = pnand %p1061_p2, %p1055_p13 }
  0x1c   : > { %v194_v16 = vld [vmem:[%s1199_s5 + $0xb0] sm:$0xff]  ;;  %v195_v18 = vld [vmem:[%s1199_s5 + $0xb8] sm:$0xff]  ;;  %v196_v20 = vld [vmem:[%s1199_s5 + $0xc0] sm:$0xff] }
  0x1d   : > { %258 = vperm.xlu1 %1051, %v189_v6   ;;  %255 = vperm.xlu0 %1050, %v188_v7   ;;  %v178_v17 = vld [vmem:[%s1199_s5 + $0x30] sm:$0xff]  ;;  %v179_v19 = vld [vmem:[%s1199_s5 + $0x38] sm:$0xff]  ;;  %v180_v21 = vld [vmem:[%s1199_s5 + $0x40] sm:$0xff] }
  0x1e   : > { %v197_v22 = vld [vmem:[%s1199_s5 + $0xc8] sm:$0xff]  ;;  %v198_v24 = vld [vmem:[%s1199_s5 + $0xd0] sm:$0xff]  ;;  %v199_v26 = vld [vmem:[%s1199_s5 + $0xd8] sm:$0xff] }
  0x1f   : > { %v181_v23 = vld [vmem:[%s1199_s5 + $0x48] sm:$0xff]  ;;  %v182_v25 = vld [vmem:[%s1199_s5 + $0x50] sm:$0xff]  ;;  %v183_v27 = vld [vmem:[%s1199_s5 + $0x58] sm:$0xff] }
  0x20   : > { %v200_v28 = vld [vmem:[%s1199_s5 + $0xe0] sm:$0xff]  ;;  %v201_v30 = vld [vmem:[%s1199_s5 + $0xe8] sm:$0xff]  ;;  %v202_v32 = vld [vmem:[%s1199_s5 + $0xf0] sm:$0xff] }
  0x21   : > { %261 = vperm.xlu1 %1051, %v190_v8   ;;  %213 = vperm.xlu0 %1050, %v174_v9   ;;  %v184_v29 = vld [vmem:[%s1199_s5 + $0x60] sm:$0xff]  ;;  %v185_v31 = vld [vmem:[%s1199_s5 + $0x68] sm:$0xff]  ;;  %v186_v33 = vld [vmem:[%s1199_s5 + $0x70] sm:$0xff] }
  0x22   : > { %v203_v34 = vld [vmem:[%s1199_s5 + $0xf8] sm:$0xff] }
  0x23   : > { %v187_v35 = vld [vmem:[%s1199_s5 + $0x78] sm:$0xff] }
  0x25   : > { %264 = vperm.xlu1 %1051, %v191_v10   ;;  %216 = vperm.xlu0 %1050, %v175_v11  }
  0x29   : > { %267 = vperm.xlu1 %1051, %v192_v12   ;;  %219 = vperm.xlu0 %1050, %v176_v13  }
  0x2d   : > { %270 = vperm.xlu1 %1051, %v193_v14   ;;  %222 = vperm.xlu0 %1050, %v177_v15  }
  0x31   : > { %273 = vperm.xlu1 %1051, %v194_v16   ;;  %225 = vperm.xlu0 %1050, %v178_v17  }
  0x35   : > { %276 = vperm.xlu1 %1051, %v195_v18   ;;  %228 = vperm.xlu0 %1050, %v179_v19  }
  0x39   : > { %279 = vperm.xlu1 %1051, %v196_v20   ;;  %231 = vperm.xlu0 %1050, %v180_v21  }
  0x3d   : > { %282 = vperm.xlu1 %1051, %v197_v22   ;;  %234 = vperm.xlu0 %1050, %v181_v23  }
  0x41   : > { %285 = vperm.xlu1 %1051, %v198_v24   ;;  %237 = vperm.xlu0 %1050, %v182_v25  }
  0x45   : > { %288 = vperm.xlu1 %1051, %v199_v26   ;;  %240 = vperm.xlu0 %1050, %v183_v27  }
  0x49   : > { %291 = vperm.xlu1 %1051, %v200_v28   ;;  %243 = vperm.xlu0 %1050, %v184_v29  }
  0x4d   : > { %294 = vperm.xlu1 %1051, %v201_v30   ;;  %246 = vperm.xlu0 %1050, %v185_v31  }
  0x51   : > { %297 = vperm.xlu1 %1051, %v202_v32   ;;  %249 = vperm.xlu0 %1050, %v186_v33  }
  0x55   : > { %300 = vperm.xlu1 %1051, %v203_v34   ;;  %252 = vperm.xlu0 %1050, %v187_v35  }
  0x98   : > { %v211_v38 = vpop.permute.xlu1 %210  ;;  %v208_v39 = vpop.permute.xlu0 %207 }
  0x99   : > { %vm303_vm1 = vcmp.eq.s32.totalorder %v211_v38, %v1233_v37  ;;  %vm302_vm2 = vcmp.eq.s32.totalorder %v208_v39, %v1233_v37 }
  0x9a   : > { %v845_v41 = vsel %vm303_vm1, 1.0, %v1117_v40  ;;  %v844_v42 = vsel %vm302_vm2, 1.0, %v1117_v40 }
  0x9b   : > { %953 = vmatprep.mubr.msk.f32.mxu0 %vm407_vm0, %v844_v42 }
  0x9c   : > { %v259_v43 = vpop.permute.xlu1 %258  ;;  %954 = vmatmul.mubr.msk.f32.vlgmr.msra.gmra.mrb[0].mxu0 %vm407_vm0, %v845_v41  ;;  %v256_v44 = vpop.permute.xlu0 %255  ;;  %v1337_v41 = vld [vmem:[%s1459_s2] ss:$0 sm:$0xff] }
  0x9d   : > { %vm319_vm3 = vcmp.eq.s32.totalorder %v259_v43, %v1233_v37  ;;  %vm318_vm4 = vcmp.eq.s32.totalorder %v256_v44, %v1233_v37 }
  0x9e   : > { %v861_v45 = vsel %vm319_vm3, 1.0, %v1117_v40  ;;  %v860_v46 = vsel %vm318_vm4, 1.0, %v1117_v40 }
  0x9f   : > { %977 = vmatprep.mubr.msk.f32.mxu1 %vm407_vm0, %v860_v46 }
  0xa0   : > { %v262_v47 = vpop.permute.xlu1 %261  ;;  %978 = vmatmul.mubr.msk.f32.vlgmr.msra.gmra.mrb[0].mxu1 %vm407_vm0, %v861_v45  ;;  %v214_v48 = vpop.permute.xlu0 %213 }
  0xa1   : > { %vm320_vm5 = vcmp.eq.s32.totalorder %v262_v47, %v1233_v37  ;;  %vm304_vm6 = vcmp.eq.s32.totalorder %v214_v48, %v1233_v37 }
  0xa2   : > { %v862_v49 = vsel %vm320_vm5, 1.0, %v1117_v40  ;;  %v846_v50 = vsel %vm304_vm6, 1.0, %v1117_v40 }
  0xa3   : > { %956 = vmatprep.mubr.msk.f32.mxu0 %vm407_vm0, %v846_v50  ;;  %980 = vmatprep.mubr.msk.f32.mxu1 %vm407_vm0, %v862_v49 }
  0xa4   : > { %v265_v51 = vpop.permute.xlu1 %264  ;;  %v217_v52 = vpop.permute.xlu0 %216 }
  0xa5   : > { %vm321_vm7 = vcmp.eq.s32.totalorder %v265_v51, %v1233_v37  ;;  %vm305_vm8 = vcmp.eq.s32.totalorder %v217_v52, %v1233_v37 }
  0xa6   : > { %v863_v53 = vsel %vm321_vm7, 1.0, %v1117_v40  ;;  %v847_v54 = vsel %vm305_vm8, 1.0, %v1117_v40 }
  0xa7   : > { %957 = vmatmul.mubr.msk.f32.gmra.mrb[2].mxu0 %vm407_vm0, %v847_v54  ;;  %981 = vmatmul.mubr.msk.f32.gmra.mrb[2].mxu1 %vm407_vm0, %v863_v53 }
  0xa8   : > { %v268_v55 = vpop.permute.xlu1 %267  ;;  %v220_v56 = vpop.permute.xlu0 %219 }
  0xa9   : > { %vm322_vm9 = vcmp.eq.s32.totalorder %v268_v55, %v1233_v37  ;;  %vm306_vm10 = vcmp.eq.s32.totalorder %v220_v56, %v1233_v37 }
  0xaa   : > { %v864_v57 = vsel %vm322_vm9, 1.0, %v1117_v40  ;;  %v848_v58 = vsel %vm306_vm10, 1.0, %v1117_v40 }
  0xab   : > { %959 = vmatprep.mubr.msk.f32.mxu0 %vm407_vm0, %v848_v58  ;;  %983 = vmatprep.mubr.msk.f32.mxu1 %vm407_vm0, %v864_v57 }
  0xac   : > { %v271_v59 = vpop.permute.xlu1 %270  ;;  %v223_v60 = vpop.permute.xlu0 %222 }
  0xad   : > { %vm323_vm11 = vcmp.eq.s32.totalorder %v271_v59, %v1233_v37  ;;  %vm307_vm12 = vcmp.eq.s32.totalorder %v223_v60, %v1233_v37 }
  0xae   : > { %v865_v61 = vsel %vm323_vm11, 1.0, %v1117_v40  ;;  %v849_v62 = vsel %vm307_vm12, 1.0, %v1117_v40 }
  0xaf   : > { %960 = vmatmul.mubr.msk.f32.gmra.mrb[4].mxu0 %vm407_vm0, %v849_v62  ;;  %984 = vmatmul.mubr.msk.f32.gmra.mrb[4].mxu1 %vm407_vm0, %v865_v61 }
  0xb0   : > { %v274_v63 = vpop.permute.xlu1 %273  ;;  %v226_v0 = vpop.permute.xlu0 %225 }
  0xb1   : > { %vm324_vm13 = vcmp.eq.s32.totalorder %v274_v63, %v1233_v37  ;;  %vm308_vm14 = vcmp.eq.s32.totalorder %v226_v0, %v1233_v37 }
  0xb2   : > { %v866_v1 = vsel %vm324_vm13, 1.0, %v1117_v40  ;;  %v850_v2 = vsel %vm308_vm14, 1.0, %v1117_v40 }
  0xb3   : > { %962 = vmatprep.mubr.msk.f32.mxu0 %vm407_vm0, %v850_v2  ;;  %986 = vmatprep.mubr.msk.f32.mxu1 %vm407_vm0, %v866_v1 }
  0xb4   : > { %v277_v3 = vpop.permute.xlu1 %276  ;;  %v229_v4 = vpop.permute.xlu0 %228 }
  0xb5   : > { %vm325_vm15 = vcmp.eq.s32.totalorder %v277_v3, %v1233_v37  ;;  %vm309_vm1 = vcmp.eq.s32.totalorder %v229_v4, %v1233_v37 }
  0xb6   : > { %v867_v5 = vsel %vm325_vm15, 1.0, %v1117_v40  ;;  %v851_v6 = vsel %vm309_vm1, 1.0, %v1117_v40 }
  0xb7   : > { %963 = vmatmul.mubr.msk.f32.gmra.mrb[6].mxu0 %vm407_vm0, %v851_v6  ;;  %987 = vmatmul.mubr.msk.f32.gmra.mrb[6].mxu1 %vm407_vm0, %v867_v5 }
  0xb8   : > { %v280_v7 = vpop.permute.xlu1 %279  ;;  %v232_v8 = vpop.permute.xlu0 %231 }
  0xb9   : > { %vm326_vm2 = vcmp.eq.s32.totalorder %v280_v7, %v1233_v37  ;;  %vm310_vm3 = vcmp.eq.s32.totalorder %v232_v8, %v1233_v37 }
  0xba   : > { %v868_v9 = vsel %vm326_vm2, 1.0, %v1117_v40  ;;  %v852_v10 = vsel %vm310_vm3, 1.0, %v1117_v40 }
  0xbb   : > { %965 = vmatprep.mubr.msk.f32.mxu0 %vm407_vm0, %v852_v10  ;;  %989 = vmatprep.mubr.msk.f32.mxu1 %vm407_vm0, %v868_v9 }
  0xbc   : > { %v283_v11 = vpop.permute.xlu1 %282  ;;  %v235_v12 = vpop.permute.xlu0 %234 }
  0xbd   : > { %vm327_vm4 = vcmp.eq.s32.totalorder %v283_v11, %v1233_v37  ;;  %vm311_vm5 = vcmp.eq.s32.totalorder %v235_v12, %v1233_v37 }
  0xbe   : > { %v869_v13 = vsel %vm327_vm4, 1.0, %v1117_v40  ;;  %v853_v14 = vsel %vm311_vm5, 1.0, %v1117_v40 }
  0xbf   : > { %966 = vmatmul.mubr.msk.f32.gmra.mrb[8].mxu0 %vm407_vm0, %v853_v14  ;;  %990 = vmatmul.mubr.msk.f32.gmra.mrb[8].mxu1 %vm407_vm0, %v869_v13 }
  0xc0   : > { %v286_v15 = vpop.permute.xlu1 %285  ;;  %v238_v16 = vpop.permute.xlu0 %237 }
  0xc1   : > { %vm328_vm6 = vcmp.eq.s32.totalorder %v286_v15, %v1233_v37  ;;  %vm312_vm7 = vcmp.eq.s32.totalorder %v238_v16, %v1233_v37 }
  0xc2   : > { %v870_v17 = vsel %vm328_vm6, 1.0, %v1117_v40  ;;  %v854_v18 = vsel %vm312_vm7, 1.0, %v1117_v40 }
  0xc3   : > { %968 = vmatprep.mubr.msk.f32.mxu0 %vm407_vm0, %v854_v18  ;;  %992 = vmatprep.mubr.msk.f32.mxu1 %vm407_vm0, %v870_v17 }
  0xc4   : > { %v289_v19 = vpop.permute.xlu1 %288  ;;  %v241_v20 = vpop.permute.xlu0 %240 }
  0xc5   : > { %vm329_vm8 = vcmp.eq.s32.totalorder %v289_v19, %v1233_v37  ;;  %vm313_vm9 = vcmp.eq.s32.totalorder %v241_v20, %v1233_v37 }
  0xc6   : > { %v871_v21 = vsel %vm329_vm8, 1.0, %v1117_v40  ;;  %v855_v22 = vsel %vm313_vm9, 1.0, %v1117_v40 }
  0xc7   : > { %969 = vmatmul.mubr.msk.f32.gmra.mrb[10].mxu0 %vm407_vm0, %v855_v22  ;;  %993 = vmatmul.mubr.msk.f32.gmra.mrb[10].mxu1 %vm407_vm0, %v871_v21 }
  0xc8   : > { %v292_v23 = vpop.permute.xlu1 %291  ;;  %v244_v24 = vpop.permute.xlu0 %243 }
  0xc9   : > { %vm330_vm10 = vcmp.eq.s32.totalorder %v292_v23, %v1233_v37  ;;  %vm314_vm11 = vcmp.eq.s32.totalorder %v244_v24, %v1233_v37 }
  0xca   : > { %v872_v25 = vsel %vm330_vm10, 1.0, %v1117_v40  ;;  %v856_v26 = vsel %vm314_vm11, 1.0, %v1117_v40 }
  0xcb   : > { %971 = vmatprep.mubr.msk.f32.mxu0 %vm407_vm0, %v856_v26  ;;  %995 = vmatprep.mubr.msk.f32.mxu1 %vm407_vm0, %v872_v25 }
  0xcc   : > { %v295_v27 = vpop.permute.xlu1 %294  ;;  %v247_v28 = vpop.permute.xlu0 %246 }
  0xcd   : > { %vm331_vm12 = vcmp.eq.s32.totalorder %v295_v27, %v1233_v37  ;;  %vm315_vm13 = vcmp.eq.s32.totalorder %v247_v28, %v1233_v37 }
  0xce   : > { %v873_v29 = vsel %vm331_vm12, 1.0, %v1117_v40  ;;  %v857_v30 = vsel %vm315_vm13, 1.0, %v1117_v40 }
  0xcf   : > { %972 = vmatmul.mubr.msk.f32.gmra.mrb[12].mxu0 %vm407_vm0, %v857_v30  ;;  %996 = vmatmul.mubr.msk.f32.gmra.mrb[12].mxu1 %vm407_vm0, %v873_v29 }
  0xd0   : > { %v298_v31 = vpop.permute.xlu1 %297  ;;  %v250_v32 = vpop.permute.xlu0 %249 }
  0xd1   : > { %vm332_vm14 = vcmp.eq.s32.totalorder %v298_v31, %v1233_v37  ;;  %vm316_vm15 = vcmp.eq.s32.totalorder %v250_v32, %v1233_v37 }
  0xd2   : > { %v874_v33 = vsel %vm332_vm14, 1.0, %v1117_v40  ;;  %v858_v34 = vsel %vm316_vm15, 1.0, %v1117_v40 }
  0xd3   : > { %974 = vmatprep.mubr.msk.f32.mxu0 %vm407_vm0, %v858_v34  ;;  %998 = vmatprep.mubr.msk.f32.mxu1 %vm407_vm0, %v874_v33 }
  0xd4   : > { %v301_v35 = vpop.permute.xlu1 %300  ;;  %v253_v36 = vpop.permute.xlu0 %252 }
  0xd5   : > { %vm333_vm1 = vcmp.eq.s32.totalorder %v301_v35, %v1233_v37  ;;  %vm317_vm2 = vcmp.eq.s32.totalorder %v253_v36, %v1233_v37 }
  0xd6   : > { %v875_v38 = vsel %vm333_vm1, 1.0, %v1117_v40  ;;  %v859_v39 = vsel %vm317_vm2, 1.0, %v1117_v40 }
  0xd7   : > { %975 = vmatmul.mubr.msk.f32.gmra.mrb[14].mxu0 %vm407_vm0, %v859_v39  ;;  %999 = vmatmul.mubr.msk.f32.gmra.mrb[14].mxu1 %vm407_vm0, %v875_v38 }
 0x16f   : > { %v955_v42 = vpop.f32.mrb[0].mxu0 }
 0x170   : > { %v576_v43 = vadd.f32 %v955_v42, %v1337_v41  ;;  %v570_v37 = vpop.f32.mrb[1].mxu0 }
 0x171   : > { %v571_v44 = vadd.f32 %v1337_v41, %v570_v37 }
 0x172   : > { %730 = vst [vmem:[%s1341_s10 + $0x8] sm:$0xff] %v576_v43 }
 0x173   : > { %729 = vst [vmem:[%s1341_s10] sm:$0xff] %v571_v44  ;;  %v979_v40 = vpop.f32.mrb[0].mxu1 }
 0x174   : > { %v656_v45 = vadd.f32 %v979_v40, %v1337_v41  ;;  %v650_v46 = vpop.f32.mrb[1].mxu1 }
 0x175   : > { %v651_v47 = vadd.f32 %v1337_v41, %v650_v46 }
 0x176   : > { %746 = vst [vmem:[%s1341_s10 + $0x88] sm:$0xff] %v656_v45 }
 0x177   : > { %745 = vst [vmem:[%s1341_s10 + $0x80] sm:$0xff] %v651_v47 }
 0x17a   : > { %v958_v48 = vpop.f32.mrb[2].mxu0  ;;  %v982_v49 = vpop.f32.mrb[2].mxu1 }
 0x17b   : > { %v586_v50 = vadd.f32 %v958_v48, %v1337_v41  ;;  %v666_v51 = vadd.f32 %v982_v49, %v1337_v41  ;;  %v580_v52 = vpop.f32.mrb[3].mxu0  ;;  %v660_v53 = vpop.f32.mrb[3].mxu1 }
 0x17c   : > { %v581_v54 = vadd.f32 %v1337_v41, %v580_v52  ;;  %v661_v55 = vadd.f32 %v1337_v41, %v660_v53 }
 0x17d   : > { %732 = vst [vmem:[%s1341_s10 + $0x18] sm:$0xff] %v586_v50  ;;  %748 = vst [vmem:[%s1341_s10 + $0x98] sm:$0xff] %v666_v51 }
 0x17e   : > { %731 = vst [vmem:[%s1341_s10 + $0x10] sm:$0xff] %v581_v54  ;;  %747 = vst [vmem:[%s1341_s10 + $0x90] sm:$0xff] %v661_v55 }
 0x182   : > { %v961_v56 = vpop.f32.mrb[4].mxu0  ;;  %v985_v57 = vpop.f32.mrb[4].mxu1 }
 0x183   : > { %v596_v58 = vadd.f32 %v961_v56, %v1337_v41  ;;  %v676_v59 = vadd.f32 %v985_v57, %v1337_v41  ;;  %v590_v60 = vpop.f32.mrb[5].mxu0  ;;  %v670_v61 = vpop.f32.mrb[5].mxu1 }
 0x184   : > { %v591_v62 = vadd.f32 %v1337_v41, %v590_v60  ;;  %v671_v63 = vadd.f32 %v1337_v41, %v670_v61 }
 0x185   : > { %734 = vst [vmem:[%s1341_s10 + $0x28] sm:$0xff] %v596_v58  ;;  %750 = vst [vmem:[%s1341_s10 + $0xa8] sm:$0xff] %v676_v59 }
 0x186   : > { %733 = vst [vmem:[%s1341_s10 + $0x20] sm:$0xff] %v591_v62  ;;  %749 = vst [vmem:[%s1341_s10 + $0xa0] sm:$0xff] %v671_v63 }
 0x18a   : > { %v964_v0 = vpop.f32.mrb[6].mxu0  ;;  %v988_v1 = vpop.f32.mrb[6].mxu1 }
 0x18b   : > { %v606_v2 = vadd.f32 %v964_v0, %v1337_v41  ;;  %v686_v3 = vadd.f32 %v988_v1, %v1337_v41  ;;  %v600_v4 = vpop.f32.mrb[7].mxu0  ;;  %v680_v5 = vpop.f32.mrb[7].mxu1 }
 0x18c   : > { %v601_v6 = vadd.f32 %v1337_v41, %v600_v4  ;;  %v681_v7 = vadd.f32 %v1337_v41, %v680_v5 }
 0x18d   : > { %736 = vst [vmem:[%s1341_s10 + $0x38] sm:$0xff] %v606_v2  ;;  %752 = vst [vmem:[%s1341_s10 + $0xb8] sm:$0xff] %v686_v3 }
 0x18e   : > { %735 = vst [vmem:[%s1341_s10 + $0x30] sm:$0xff] %v601_v6  ;;  %751 = vst [vmem:[%s1341_s10 + $0xb0] sm:$0xff] %v681_v7 }
 0x192   : > { %v967_v8 = vpop.f32.mrb[8].mxu0  ;;  %v991_v9 = vpop.f32.mrb[8].mxu1 }
 0x193   : > { %v616_v10 = vadd.f32 %v967_v8, %v1337_v41  ;;  %v696_v11 = vadd.f32 %v991_v9, %v1337_v41  ;;  %v610_v12 = vpop.f32.mrb[9].mxu0  ;;  %v690_v13 = vpop.f32.mrb[9].mxu1 }
 0x194   : > { %v611_v14 = vadd.f32 %v1337_v41, %v610_v12  ;;  %v691_v15 = vadd.f32 %v1337_v41, %v690_v13 }
 0x195   : > { %738 = vst [vmem:[%s1341_s10 + $0x48] sm:$0xff] %v616_v10  ;;  %754 = vst [vmem:[%s1341_s10 + $0xc8] sm:$0xff] %v696_v11 }
 0x196   : > { %737 = vst [vmem:[%s1341_s10 + $0x40] sm:$0xff] %v611_v14  ;;  %753 = vst [vmem:[%s1341_s10 + $0xc0] sm:$0xff] %v691_v15 }
 0x19a   : > { %v970_v16 = vpop.f32.mrb[10].mxu0  ;;  %v994_v17 = vpop.f32.mrb[10].mxu1 }
 0x19b   : > { %v626_v18 = vadd.f32 %v970_v16, %v1337_v41  ;;  %v706_v19 = vadd.f32 %v994_v17, %v1337_v41  ;;  %v620_v20 = vpop.f32.mrb[11].mxu0  ;;  %v700_v21 = vpop.f32.mrb[11].mxu1 }
 0x19c   : > { %v621_v22 = vadd.f32 %v1337_v41, %v620_v20  ;;  %v701_v23 = vadd.f32 %v1337_v41, %v700_v21 }
 0x19d   : > { %740 = vst [vmem:[%s1341_s10 + $0x58] sm:$0xff] %v626_v18  ;;  %756 = vst [vmem:[%s1341_s10 + $0xd8] sm:$0xff] %v706_v19 }
 0x19e   : > { %739 = vst [vmem:[%s1341_s10 + $0x50] sm:$0xff] %v621_v22  ;;  %755 = vst [vmem:[%s1341_s10 + $0xd0] sm:$0xff] %v701_v23 }
 0x1a2   : > { %v973_v24 = vpop.f32.mrb[12].mxu0  ;;  %v997_v25 = vpop.f32.mrb[12].mxu1 }
 0x1a3   : > { %v636_v26 = vadd.f32 %v973_v24, %v1337_v41  ;;  %v716_v27 = vadd.f32 %v997_v25, %v1337_v41  ;;  %v630_v28 = vpop.f32.mrb[13].mxu0  ;;  %v710_v29 = vpop.f32.mrb[13].mxu1 }
 0x1a4   : > { %v631_v30 = vadd.f32 %v1337_v41, %v630_v28  ;;  %v711_v31 = vadd.f32 %v1337_v41, %v710_v29 }
 0x1a5   : > { %742 = vst [vmem:[%s1341_s10 + $0x68] sm:$0xff] %v636_v26  ;;  %758 = vst [vmem:[%s1341_s10 + $0xe8] sm:$0xff] %v716_v27 }
 0x1a6   : > { %741 = vst [vmem:[%s1341_s10 + $0x60] sm:$0xff] %v631_v30  ;;  %757 = vst [vmem:[%s1341_s10 + $0xe0] sm:$0xff] %v711_v31 }
 0x1aa   : > { %v976_v32 = vpop.f32.mrb[14].mxu0  ;;  %v1000_v33 = vpop.f32.mrb[14].mxu1 }
 0x1ab   : > { %v646_v34 = vadd.f32 %v976_v32, %v1337_v41  ;;  %v726_v35 = vadd.f32 %v1000_v33, %v1337_v41  ;;  %v640_v36 = vpop.f32.mrb[15].mxu0  ;;  %v720_v38 = vpop.f32.mrb[15].mxu1 }
 0x1ac   : > { %v641_v39 = vadd.f32 %v1337_v41, %v640_v36  ;;  %v721_v42 = vadd.f32 %v1337_v41, %v720_v38 }
 0x1ad   : > { %744 = vst [vmem:[%s1341_s10 + $0x78] sm:$0xff] %v646_v34  ;;  %760 = vst [vmem:[%s1341_s10 + $0xf8] sm:$0xff] %v726_v35 }
 0x1ae   : > { %743 = vst [vmem:[%s1341_s10 + $0x70] sm:$0xff] %v641_v39  ;;  %759 = vst [vmem:[%s1341_s10 + $0xf0] sm:$0xff] %v721_v42 }
 0x1af   : > { %1065 = shalt.err (!%p1062_p3)
}
 0x1b0   : > { %s1066_s29 = scalar_lea.hbm %s1404_s24, 4096  ;;  %s1070_s5 = scalar_lea.hbm %s1460_s3, 8192 }
 0x1b1   : > { %p1067_p4 = scmp.ne.s32.totalorder %s1404_s24, %s1066_s29  ;;  %p1071_p9 = scmp.lt.u32.totalorder %s1404_s24, %s1460_s3 }
 0x1b2   : > { %p1072_p10 = scmp.lt.u32.totalorder %s1070_s5, %s1066_s29  ;;  %p1074_p12 = scmp.lt.u32.totalorder %s1066_s29, %s1404_s24 }
 0x1b3   : > { %p1068_p7 = pnand %p1067_p4, %p1179_p5 }
 0x1b4   : > { %p1073_p11 = por %p1072_p10, %p1071_p9 }
 0x1b5   : > { %p1069_p8 = pneg %p1068_p7 }
 0x1b6   : > { %p1075_p13 = por %p1074_p12, %p1073_p11 }
 0x1b8   : > { %p1076_p0 = pnand %p1075_p13, %p1069_p8 }
 0x1ba   : > { %1079 = shalt.err (!%p1076_p0)
}
 0x1bb   : > { %s1119_s8 = smov 128   ;;  %s1120_s9 = smov 8  }
 0x1bc   : > { %1007 = dma.vmem_to_hbm [thread:$0]  (%p1179_p5), %s1406_s17, 4096, %s1404_s24, %s1416_s16, %s1119_s8, %s1119_s8, %s1120_s9  }
 0x1bd PF: > { %p1013_p1 = scmp.ge.s32.totalorder %s1114_s15, 2  ;;  %s790_s10 = sand.u32 1, %s1102_s12  }
 0x1be   : > { %s791_s11 = scalar_lea.sflag [#allocation3], %s790_s10 }
 0x1bf   : > { %p1010_p2 = pnand %p1013_p1, %p1183_p6 }
 0x1c1   : > { %1097 = dma.done.wait (!%p1010_p2), %s791_s11, 4096  }
 0x1c2   : > { %1099 = vsyncadd (!%p1010_p2), %s791_s11, 4294963200  ;;  %p13_p3 = scmp.ge.s32.totalorder %s1166_s18, 4   ;;  %s1463_s12 = smov %s1106_s13 }
 0x1c3   : > { %s1464_s13 = smov %s1110_s14  ;;  %s1465_s14 = smov %s1177_s21 }
 0x1c4   : > { %s1466_s15 = smov %s1166_s18  ;;  %15 = sbr.rel (!%p13_p3) target bundleno = 3 (0x3), region = 67 }
 0x1cb   :  { %796 = vsyncpa [#allocation3], 1 }
 0x1cc   :  { %798 = vsyncpa [#allocation3 + $0x1], 1 }

</bundles_post_ra>
